<compile_context>
chip_gen: v5e
topology: v5e:2x2
jax: 0.10.0
libtpu: 0.0.40
codegen_flags: <defaults>
</compile_context>

<pallas_src>
import functools

import jax
import jax.numpy as jnp
from jax.experimental import pallas as pl
from jax.experimental.pallas import tpu as pltpu


# ----------------------------- Pallas kernels --------------------------------

def _logweights_kernel(x_ref, lw_ref, *, gc):
    # x_ref block: (1, c, tile) -- lane axis = spatial (H*W) tile.
    # Only the last G (logweight) channels are consumed; means are NOT written
    # back (review opt #1) -- they are a pure view of x, returned by the
    # wrapper as a lazy slice/reshape.
    lw = x_ref[:, gc:, :].astype(jnp.float32)          # (1, G, tile)
    m = jnp.max(lw, axis=1, keepdims=True)
    s = lw - m
    lse = jnp.log(jnp.sum(jnp.exp(s), axis=1, keepdims=True))
    lw_ref[...] = (s - lse).astype(lw_ref.dtype)


def _logstd_mlp_kernel(emb_ref, w1_ref, b1_ref, w2_ref, b2_ref, out_ref):
    # Tiny per-call MLP: SiLU -> Linear(E, inner) -> SiLU -> Linear(inner, 1).
    # Runs once (grid-less), everything resident in VMEM.
    e = emb_ref[...].astype(jnp.float32)               # (bs, E)
    h = e * jax.nn.sigmoid(e)                          # SiLU
    h = jnp.dot(h, w1_ref[...].astype(jnp.float32),
                preferred_element_type=jnp.float32)
    h = h + b1_ref[...].astype(jnp.float32)
    h = h * jax.nn.sigmoid(h)                          # SiLU
    # (inner -> 1) on the VPU: broadcast-mul + lane reduce (no N=1 MXU matmul).
    o = jnp.sum(h * w2_ref[...].astype(jnp.float32), axis=-1, keepdims=True)
    out_ref[...] = (o + b2_ref[...].astype(jnp.float32)).astype(out_ref.dtype)


# --------------------------- tile / VMEM selection ----------------------------

def _vmem_limit_bytes():
    # Generation-aware VMEM budget (review opt #5): ~3/4 of physical capacity,
    # capped at 96 MiB (v5e/v6e: 128 MiB physical; v7x: 64 MiB per TensorCore).
    try:
        cap = int(pltpu.get_tpu_info().vmem_capacity_bytes)
    except Exception:
        cap = 64 * 1024 * 1024          # conservative fallback: assume v7x
    return max(16 * 1024 * 1024, min(cap * 3 // 4, 96 * 1024 * 1024))


def _pick_lane_tile(hw, c, g, elt, vmem_limit, lane_block=None):
    # Review opt #2: target ~4 MiB x-blocks using the real element size.
    if lane_block is None:
        lane_block = ((4 << 20) // (c * elt)) // 128 * 128
    else:
        lane_block = (lane_block // 128) * 128
    lane_block = max(128, lane_block)
    # Double-buffered in (c channels) + out (G channels) blocks must fit the
    # VMEM budget with headroom for compiler-internal scratch.
    per_lane_bytes = 2 * (c + g) * elt
    cap = max(128, ((vmem_limit // 2) // per_lane_bytes) // 128 * 128)
    tile = min(lane_block, cap)
    # Never bigger than the (128-rounded-up) spatial extent (review opt #4:
    # always a 128-multiple tile; trailing partial block is masked by Pallas).
    tile = min(tile, max(128, pl.cdiv(hw, 128) * 128))
    return tile


# ------------------------------ Python wrapper --------------------------------

def gm_output_2d(x, emb, params, *, num_gaussians, out_channels, lane_block=None):
    """Pallas implementation of GMOutput2D.forward (constant_logstd=None path)."""
    bs, c, h, w = x.shape
    G, C = num_gaussians, out_channels
    gc = G * C
    assert c == gc + G, f"expected {gc + G} channels, got {c}"
    E = emb.shape[1]
    inner = params["w1"].shape[1]
    HW = h * w
    elt = jnp.dtype(x.dtype).itemsize

    # Spatial -> lane axis (free reshape for 128-aligned widths; for small w
    # XLA may relayout once outside the kernel).
    x3 = x.reshape(bs, c, HW)

    vmem_limit = _vmem_limit_bytes()
    tile = _pick_lane_tile(HW, c, G, elt, vmem_limit, lane_block)
    n_t = pl.cdiv(HW, tile)

    # ---- main kernel: log_softmax over the gaussian axis, logweights only ----
    lw_flat = pl.pallas_call(
        functools.partial(_logweights_kernel, gc=gc),
        out_shape=jax.ShapeDtypeStruct((bs, G, HW), x.dtype),
        grid=(bs, n_t),
        in_specs=[pl.BlockSpec((1, c, tile), lambda b, t: (b, 0, t))],
        out_specs=pl.BlockSpec((1, G, tile), lambda b, t: (b, 0, t)),
        compiler_params=pltpu.CompilerParams(
            # Both axes independent now (logstds MLP hoisted out) -> both
            # "parallel"; on v7x both TensorCores get spatial tiles even at bs=1.
            dimension_semantics=("parallel", "parallel"),
            vmem_limit_bytes=vmem_limit,
        ),
    )(x3)

    # ---- logstds MLP: tiny, separate grid-less pallas_call (review opt #3) ----
    logstds = pl.pallas_call(
        _logstd_mlp_kernel,
        out_shape=jax.ShapeDtypeStruct((bs, 1), jnp.float32),
    )(emb, params["w1"], params["b1"], params["w2"].reshape(1, inner), params["b2"])

    # ---- means: pure view of x (matches PyTorch's split/view semantics) ------
    # TODO(synk): a fused consumer should take x + channel offset instead of
    # forcing this slice to materialize.
    means = x[:, :gc].reshape(bs, G, C, h, w)

    return dict(
        means=means,
        logweights=lw_flat.reshape(bs, G, 1, h, w),
        logstds=logstds.reshape(bs, 1, 1, 1, 1),
    )


# ------------------------------- Reference ------------------------------------

def _reference(x, emb, params, G, C):
    bs, c, h, w = x.shape
    means = x[:, : G * C].reshape(bs, G, C, h, w)
    lw = x[:, G * C:].reshape(bs, G, 1, h, w)
    logweights = jax.nn.log_softmax(lw, axis=1)
    e = jax.nn.silu(emb)
    hid = jax.nn.silu(e @ params["w1"] + params["b1"])
    logstds = (hid @ params["w2"] + params["b2"]).reshape(bs, 1, 1, 1, 1)
    return means, logweights, logstds


# --------------------------------- main ----------------------------------------

if __name__ == "__main__":
    # Small, module-consistent shapes.
    num_gaussians = 4        # G
    out_channels = 3         # C
    embed_dim = 32           # E
    logstd_inner_dim = 128   # inner dim of the logstd MLP (default 1024, shrunk)
    bs = 2
    in_ch = num_gaussians * out_channels + num_gaussians  # 16

    key = jax.random.PRNGKey(0)
    kx, ke, k1, k2, kx2 = jax.random.split(key, 5)

    # Deterministic parameter init (xavier-uniform-like scales).  NOTE: the
    # PyTorch init_weights() zeroes the last Linear; we use small non-zero
    # deterministic weights so the kernel path is exercised non-trivially.
    lim1 = (6.0 / (embed_dim + logstd_inner_dim)) ** 0.5
    lim2 = (6.0 / (logstd_inner_dim + 1)) ** 0.5
    params = {
        "w1": jax.random.uniform(k1, (embed_dim, logstd_inner_dim),
                                 minval=-lim1, maxval=lim1, dtype=jnp.float32),
        "b1": jnp.zeros((1, logstd_inner_dim), dtype=jnp.float32),
        "w2": jax.random.uniform(k2, (logstd_inner_dim, 1),
                                 minval=-lim2, maxval=lim2, dtype=jnp.float32),
        "b2": jnp.zeros((1, 1), dtype=jnp.float32),
    }

    emb = jax.random.normal(ke, (bs, embed_dim), dtype=jnp.float32)

    def run_and_check(h, w, lane_block, kx_):
        x = jax.random.normal(kx_, (bs, in_ch, h, w), dtype=jnp.float32)
        out = gm_output_2d(x, emb, params, num_gaussians=num_gaussians,
                           out_channels=out_channels, lane_block=lane_block)
        jax.block_until_ready(out)

        ref_means, ref_logw, ref_logstd = _reference(
            x, emb, params, num_gaussians, out_channels)

        assert out["means"].shape == (bs, num_gaussians, out_channels, h, w)
        assert out["logweights"].shape == (bs, num_gaussians, 1, h, w)
        assert out["logstds"].shape == (bs, 1, 1, 1, 1)
        assert jnp.allclose(out["means"], ref_means, atol=1e-6, rtol=1e-6)
        assert jnp.allclose(out["logweights"], ref_logw, atol=1e-5, rtol=1e-5)
        assert jnp.allclose(out["logstds"], ref_logstd, atol=1e-4, rtol=1e-4)

    # 1) H*W = 1024, lane_block=256 -> 4 spatial tiles per batch row (exercises
    #    the multi-tile, fully-parallel grid path).
    run_and_check(32, 32, 256, kx)
    # 2) H*W = 400 (not a multiple of 128) -> single 512-lane tile with a masked
    #    trailing partial block (exercises review opt #4; padding lanes benign).
    run_and_check(20, 20, None, kx2)

    print("KERNEL_OK")
</pallas_src>

<mosaic_0001>
module attributes {stable_mosaic.version = 11 : i64} {
  func.func @_logweights_kernel(%arg0: i32, %arg1: i32, %arg2: memref<1x16x256xf32, #tpu.memory_space<vmem>>, %arg3: memref<1x4x256xf32, #tpu.memory_space<vmem>>) attributes {dimension_semantics = [#tpu.dimension_semantics<parallel>, #tpu.dimension_semantics<parallel>], iteration_bounds = array<i64: 2, 4>, scalar_prefetch = 0 : i64, scratch_operands = 0 : i64, tpu.core_type = #tpu.core_type<tc>, window_params = [{transform_indices = @transform_0, window_bounds = array<i64: 1, 16, 256>}, {transform_indices = @transform_1, window_bounds = array<i64: 1, 4, 256>}]} {
    %c0 = arith.constant 0 : index
    %c12 = arith.constant 12 : index
    %c0_0 = arith.constant 0 : index
    %0 = vector.load %arg2[%c0, %c12, %c0_0] : memref<1x16x256xf32, #tpu.memory_space<vmem>>, vector<1x4x256xf32>
    %cst = arith.constant dense<0xFF800000> : vector<1x256xf32>
    %1 = vector.multi_reduction <maximumf>, %0, %cst [1] : vector<1x4x256xf32> to vector<1x256xf32>
    %2 = vector.shape_cast %1 : vector<1x256xf32> to vector<1x1x256xf32>
    %3 = vector.broadcast %2 : vector<1x1x256xf32> to vector<1x4x256xf32>
    %4 = arith.subf %0, %3 : vector<1x4x256xf32>
    %5 = math.exp %4 : vector<1x4x256xf32>
    %cst_1 = arith.constant dense<0.000000e+00> : vector<1x256xf32>
    %6 = vector.multi_reduction <add>, %5, %cst_1 [1] : vector<1x4x256xf32> to vector<1x256xf32>
    %7 = vector.shape_cast %6 : vector<1x256xf32> to vector<1x1x256xf32>
    %8 = math.log %7 : vector<1x1x256xf32>
    %9 = vector.broadcast %8 : vector<1x1x256xf32> to vector<1x4x256xf32>
    %10 = arith.subf %4, %9 : vector<1x4x256xf32>
    %c0_2 = arith.constant 0 : index
    %c0_3 = arith.constant 0 : index
    %c0_4 = arith.constant 0 : index
    %11 = vector.load %arg3[%c0_2, %c0_3, %c0_4] : memref<1x4x256xf32, #tpu.memory_space<vmem>>, vector<1x4x256xf32>
    tpu.vector_store %arg3[%c0_2, %c0_3, %c0_4], %10 {strides = array<i32>} : memref<1x4x256xf32, #tpu.memory_space<vmem>>, vector<1x4x256xf32>,
    return
  }
  func.func @transform_0(%arg0: i32, %arg1: i32) -> (i32, i32, i32) {
    %c0_i32 = arith.constant 0 : i32
    %c0_i32_0 = arith.constant 0 : i32
    return %arg0, %c0_i32, %arg1 : i32, i32, i32
  }
  func.func @transform_1(%arg0: i32, %arg1: i32) -> (i32, i32, i32) {
    %c0_i32 = arith.constant 0 : i32
    %c0_i32_0 = arith.constant 0 : i32
    return %arg0, %c0_i32, %arg1 : i32, i32, i32
  }
}

</mosaic_0001>

<bundles_post_ra>
// kernel: tpu_custom_call.1
= control target key start
LH: loop header
LB: loop body
LE: loop exit
PB: predicated region body
PF: predicated region fallthrough
CT: control target
= control target key end

     0   :  { %6 = vsyncpa [#allocation3], 0  ;;  %s713_s0 = inlined_call_operand.hbm [shape: f32[2,16,1024], index: 0, kind: input, shape index: {}]   ;;  %s714_s1 = inlined_call_operand.hbm [shape: f32[2,4,1024], index: 1, kind: output, shape index: {}]  }
   0x1   :  { %8 = vsyncpa [#allocation3 + $0x1], 0 }
   0x2   :  { %9 = vsyncpa [#allocation4], 0 }
   0x3   :  { %11 = vsyncpa [#allocation4 + $0x1], 0  ;;  %s570_s6 = smov 0   ;;  %s572_s7 = smov 0  }
   0x4   :  { %s574_s8 = smov 0   ;;  %s576_s9 = smov 0  }
   0x5   :  { %s578_s10 = smov 0   ;;  %s580_s11 = smov 0  }
   0x6   :  { %s582_s12 = smov 0   ;;  %s584_s13 = smov 0  }
   0x7 LB: > { %s321_s14 = sadd.s32 4294967295, %s555_s13   ;;  %s322_s15 = sadd.s32 4294967294, %s555_s13   ;;  %s555_s13 = sphi %s584_s13, %s17_s13   ;;  %s551_s12 = sphi %s582_s12, %s731_s12   ;;  %s547_s11 = sphi %s580_s11, %s730_s11   ;;  %s543_s10 = sphi %s578_s10, %s729_s10   ;;  %s539_s9 = sphi %s576_s9, %s728_s9   ;;  %s535_s8 = sphi %s574_s8, %s727_s8   ;;  %s531_s7 = sphi %s572_s7, %s726_s7   ;;  %s527_s6 = sphi %s570_s6, %s725_s6  }
   0x8   : > { %s26_s16 = sadd.s32 1, %s547_s11  ;;  %s29_s17 = sadd.s32 1, %s551_s12 }
   0x9   : > { %p27_p0 = scmp.ge.s32.totalorder %s26_s16, 4  ;;  %s38_s18 = sadd.s32 1, %s535_s8 }
   0xa   : > { %p45_p1 = scmp.ne.s32.totalorder %s535_s8, %s531_s7  ;;  %p46_p2 = scmp.eq.s32.totalorder %s555_s13, 0 }
   0xb   : > { %s733_s16 = smov (%p27_p0, %s26_s16), 0  ;;  %s735_s17 = smov (!%p27_p0, %s29_s17), %s551_s12 }
   0xc   : > { %717 = sst [smem:[#allocation8_spill]] %s733_s16  ;;  %s34_s19 = ssub.s32 %s547_s11, %s733_s16 }
   0xd   : > { %p623_p3 = por %p46_p2, %p45_p1  ;;  %p31_p4 = scmp.ge.s32.totalorder %s735_s17, 2 }
   0xe   : > { %p51_p5 = scmp.ne.s32.totalorder %s531_s7, %s527_s6  ;;  %p52_p6 = scmp.eq.s32.totalorder %s321_s14, 0 }
   0xf   : > { %p77_p7 = scmp.eq.s32.totalorder %s321_s14, 7  ;;  %s737_s17 = smov (%p31_p4, %s735_s17), 0 }
  0x10   : > { %719 = sst [smem:[#allocation9_spill]] %s737_s17  ;;  %p631_p8 = por %p52_p6, %p51_p5 }
  0x11   : > { %p635_p9 = por %p77_p7, %p45_p1  ;;  %s33_s23 = ssub.s32 %s551_s12, %s737_s17 }
  0x12   : > { %p83_p10 = scmp.eq.s32.totalorder %s322_s15, 7  ;;  %s35_s24 = sor.u32 %s34_s19, %s33_s23 }
  0x13   : > { %p36_p11 = scmp.eq.s32.totalorder %s35_s24, 0  ;;  %p350_p13 = scmp.lt.s32.totalorder %s555_s13, 8 }
  0x14   : > { %p641_p12 = por %p83_p10, %p51_p5  ;;  %s103_s26 = sand.u32 1, %s535_s8  }
  0x15   : > { %s648_s27 = scalar_select %p36_p11, %s535_s8, %s38_s18  }
  0x16   : > { %s325_s28 = sshll.u32 %s103_s26, 5  ;;  %s326_s29 = sshll.u32 %s547_s11, 1 }
  0x17   : > { %s327_s30 = sshll.u32 %s551_s12, 4  ;;  %s107_s2 = scalar_lea.vmem [#allocation2], %s325_s28 }
  0x18   : > { %s117_s3 = sshll.u32 %s107_s2, 4  ;;  %s112_s4 = sadd.s32 %s327_s30, %s326_s29  ;;  %s118_s3 = int_to_ptr.vmem [resolvable:$true] %s117_s3 }
  0x19   : > { %s328_s5 = sshll.u32 %s112_s4, 3  ;;  %p343_p0 = pnand %p350_p13, %p623_p3 }
  0x1a   : > { %s114_s19 = scalar_lea.hbm %s713_s0, %s328_s5  ;;  %p329_p1 = scmp.ge.s32.totalorder %s555_s13, 1 }
  0x1b   : > { %s115_s23 = sshll.u32 %s114_s19, 4  ;;  %s104_s18 = scalar_lea.sflag [#allocation3], %s103_s26  ;;  %s116_s23 = int_to_ptr.hbm [resolvable:$true] %s115_s23 }
  0x1c   : > { %s557_s24 = smov 1024   ;;  %s558_s17 = smov 256  }
  0x1d   : > { %s559_s16 = smov 16   ;;  %p125_p2 = scmp.lt.s32.totalorder %s555_s13, 9 }
  0x1e   : > { %345 = dma.hbm_to_vmem [thread:$0]  (!%p343_p0), %s116_s23, 512, %s118_s3, %s104_s18, %s557_s24, %s558_s17, %s559_s16  }
  0x1f   : > { %p126_p4 = pnand %p329_p1, %p125_p2 }
  0x20   : > { %s660_s28 = sand.u32 (!%p126_p4), 1, %s531_s7  }
  0x21   : > { %129 = sbr.rel (%p126_p4) target bundleno = 102 (0x66), region = 24  ;;  %s330_s20 = sshll.u32 (!%p126_p4), %s660_s28, 5 }
  0x22   : > { %s132_s29 = scalar_lea.sflag (!%p126_p4), [#allocation3], %s660_s28  ;;  %s135_s30 = scalar_lea.vmem (!%p126_p4), [#allocation2], %s330_s20 }
  0x26   : > { %518 = dma.done.wait (%p631_p8), %s132_s29, 512  }
  0x27   : > { %520 = vsyncadd (%p631_p8), %s132_s29, 4294966784  ;;  %vm159_vm0 = vcmask 1047556   ;;  %v157_v0 = vld [vmem:[%s135_s30 + $0x10] sm:$0xf0]  ;;  %v158_v1 = vld [vmem:[%s135_s30 + $0x18] sm:$0xf0] }
  0x28   : > { %v160_v2 = vsel %vm159_vm0, %v157_v0, -inf  ;;  %v167_v3 = vsel %vm159_vm0, %v158_v1, -inf  ;;  %vm186_vm1 = vcmask 1043456   ;;  %s333_s16 = sshll.u32 %s539_s9, 1  ;;  %s334_s17 = sshll.u32 %s543_s10, 3 }
  0x29   : > { %v161_v4 = vrot.slane %v160_v2, 4  ;;  %v168_v5 = vrot.slane %v167_v3, 4  ;;  %s227_s21 = sadd.s32 %s334_s17, %s333_s16  ;;  %s331_s26 = sshll.u32 %s660_s28, 3 }
  0x2a   : > { %s335_s2 = sshll.u32 %s227_s21, 2  ;;  %s154_s14 = scalar_lea.vmem [#allocation5], %s331_s26 }
  0x2b   : > { %v162_v6 = vmax.f32 %v160_v2, %v161_v4  ;;  %v169_v7 = vmax.f32 %v167_v3, %v168_v5  ;;  %s229_s5 = scalar_lea.hbm %s714_s1, %s335_s2  ;;  %s231_s9 = sshll.u32 %s154_s14, 4  ;;  %s232_s9 = int_to_ptr.vmem [resolvable:$true] %s231_s9 }
  0x2c   : > { %s233_s10 = sshll.u32 %s229_s5, 4  ;;  %s216_s15 = scalar_lea.sflag [#allocation4], %s660_s28  ;;  %s234_s10 = int_to_ptr.hbm [resolvable:$true] %s233_s10 }
  0x2d   : > { %v163_v8 = vrot.slane %v162_v6, 2  ;;  %v170_v9 = vrot.slane %v169_v7, 2  ;;  %s471_s19 = sshra.s32 %s234_s10, 4  ;;  %s477_s20 = scalar_lea.hbm %s714_s1, 64  ;;  %s472_s19 = int_to_ptr.hbm [resolvable:$true] %s471_s19 }
  0x2e   : > { %s473_s23 = scalar_lea.hbm %s472_s19, 8  ;;  %p478_p7 = scmp.lt.s32.totalorder %s472_s19, %s714_s1 }
  0x2f   : > { %v164_v10 = vmax.f32 %v162_v6, %v163_v8  ;;  %v171_v11 = vmax.f32 %v169_v7, %v170_v9  ;;  %p474_p3 = scmp.ne.s32.totalorder %s472_s19, %s473_s23  ;;  %p479_p8 = scmp.lt.s32.totalorder %s477_s20, %s473_s23 }
  0x31   : > { %v165_v12 = vrot.slane %v164_v10, 1  ;;  %v172_v13 = vrot.slane %v171_v11, 1  ;;  %p475_p5 = pnand %p474_p3, %p635_p9  ;;  %p480_p10 = por %p479_p8, %p478_p7 }
  0x33   : > { %v166_v14 = vmax.f32 %v164_v10, %v165_v12  ;;  %v173_v15 = vmax.f32 %v171_v11, %v172_v13  ;;  %p476_p6 = pneg %p475_p5 }
  0x35   : > { %v174_v16 = vsub.f32 %v157_v0, %v166_v14  ;;  %v175_v17 = vsub.f32 %v158_v1, %v173_v15  ;;  %p481_p11 = pnand %p480_p10, %p476_p6 }
  0x37   : > { %v176_v18 = vmul.f32 1.442695, %v174_v16  ;;  %v178_v19 = vmul.f32 1.442695, %v175_v17 }
  0x39   : > { %419 = vpow2.f32 %v176_v18 }
  0x3a   : > { %421 = vpow2.f32 %v178_v19 }
  0x3f   : > { %v420_v20 = vpop.eup %419 }
  0x40   : > { %v422_v21 = vpop.eup %421  ;;  %v182_v22 = vrot.slane %v420_v20, 4 }
  0x41   : > { %v183_v23 = vrot.slane %v422_v21, 4 }
  0x42   : > { %v187_v24 = vsel %vm186_vm1, %v182_v22, 0.0 }
  0x43   : > { %v188_v25 = vrot.slane %v187_v24, 4  ;;  %v194_v26 = vsel %vm186_vm1, %v183_v23, 0.0 }
  0x44   : > { %v195_v27 = vrot.slane %v194_v26, 4 }
  0x45   : > { %v189_v28 = vadd.f32 %v188_v25, %v187_v24 }
  0x46   : > { %v196_v29 = vadd.f32 %v195_v27, %v194_v26 }
  0x47   : > { %v190_v30 = vrot.slane %v189_v28, 2 }
  0x48   : > { %v197_v31 = vrot.slane %v196_v29, 2 }
  0x49   : > { %v191_v32 = vadd.f32 %v190_v30, %v189_v28 }
  0x4a   : > { %v198_v33 = vadd.f32 %v197_v31, %v196_v29 }
  0x4b   : > { %v192_v34 = vrot.slane %v191_v32, 1 }
  0x4c   : > { %v199_v35 = vrot.slane %v198_v33, 1 }
  0x4d   : > { %v193_v36 = vadd.f32 %v192_v34, %v191_v32 }
  0x4e   : > { %v200_v37 = vadd.f32 %v199_v35, %v198_v33 }
  0x4f   : > { %423 = vlog2.f32 %v193_v36 }
  0x50   : > { %425 = vlog2.f32 %v200_v37 }
  0x55   : > { %v424_v38 = vpop.eup %423 }
  0x56   : > { %v426_v39 = vpop.eup %425  ;;  %v202_v40 = vmul.f32 0.6931472, %v424_v38 }
  0x57   : > { %v204_v41 = vmul.f32 0.6931472, %v426_v39 }
  0x58   : > { %v205_v42 = vsub.f32 %v174_v16, %v202_v40 }
  0x59   : > { %v206_v43 = vsub.f32 %v175_v17, %v204_v41 }
  0x5a   : > { %209 = vst.sshfl [vmem:[#allocation1] sm:$0xff pattern:$0x75316420] %v205_v42 }
  0x5b   : > { %210 = vst.sshfl [vmem:[#allocation1 + $0x8] sm:$0xff pattern:$0x75316420] %v206_v43 }
  0x62   : > { %v212_v44 = vld [vmem:[#allocation1 + $0x1] ss:$2 sm:$0xff] }
  0x63   : > { %214 = vst [vmem:[%s154_s14] sm:$0xff] %v212_v44 }
  0x64   : > { %484 = shalt.err (!%p481_p11)
}
  0x65   : > { %340 = dma.vmem_to_hbm [thread:$0]  (%p635_p9), %s232_s9, 128, %s234_s10, %s216_s15  }
  0x66 PF: > { %p351_p13 = scmp.ge.s32.totalorder %s555_s13, 2  ;;  %s245_s28 = sand.u32 1, %s527_s6  }
  0x67   : > { %s246_s16 = scalar_lea.sflag [#allocation4], %s245_s28 }
  0x68   : > { %p347_p0 = pnand %p351_p13, %p641_p12 }
  0x6a   : > { %p348_p1 = pneg %p347_p0 }
  0x6c   : > { %522 = dma.done.wait (%p348_p1), %s246_s16, 128  }
  0x6d   : > { %524 = vsyncadd (%p348_p1), %s246_s16, 4294967168  ;;  %s17_s13 = sadd.s32 1, %s555_s13   ;;  %s723_s22 = sld [smem:[#allocation8_spill]] }
  0x6e   : > { %p14_p2 = scmp.ge.s32.totalorder %s17_s13, 10   ;;  %s724_s17 = sld [smem:[#allocation9_spill]] }
  0x6f   : > { %s725_s6 = smov %s531_s7  ;;  %s726_s7 = smov %s535_s8 }
  0x70   : > { %s727_s8 = smov %s648_s27  ;;  %s728_s9 = smov %s547_s11 }
  0x71   : > { %s729_s10 = smov %s551_s12  ;;  %16 = sbr.rel (!%p14_p2) target bundleno = 7 (0x7), region = 70 }
  0x73   : > { %s730_s11 = smov %s723_s22 }
  0x74   : > { %s731_s12 = smov %s724_s17 }
  0x76   :  { %252 = vsyncpa [#allocation3], 1 }
  0x77   :  { %254 = vsyncpa [#allocation3 + $0x1], 1 }
  0x78   :  { %255 = vsyncpa [#allocation4], 1 }
  0x79   :  { %257 = vsyncpa [#allocation4 + $0x1], 1 }

</bundles_post_ra>
